<compile_context>
chip_gen: v7x
topology: tpu7x:2x2x1
jax: 0.10.0
libtpu: 0.0.40
codegen_flags: <defaults>
</compile_context>

<pallas_src>
import jax
import jax.numpy as jnp
from jax import lax
from jax.experimental import pallas as pl
from jax.experimental.pallas import tpu as pltpu


def _softplus(x):
    # Numerically stable softplus built from exp/log/max only (lowers cleanly
    # in Mosaic; also used by the pure-JAX reference so both sides agree).
    return jnp.maximum(x, 0.0) + jnp.log(1.0 + jnp.exp(-jnp.abs(x)))


def _make_kv_kernel(cqp):
    """Phase 1: KV += K @ V^T and Ksum += sum_n K, accumulated over HW tiles.

    K and V come from ONE stacked 1x1-conv matmul [Wk; Wv] @ x
    (bf16 operands, f32 accumulation).
    """

    def kernel(x_ref, wkv_ref, bkv_ref, kv_ref, ks_ref):
        j = pl.program_id(1)

        @pl.when(j == 0)
        def _init():
            kv_ref[...] = jnp.zeros_like(kv_ref)
            ks_ref[...] = jnp.zeros_like(ks_ref)

        x = x_ref[0]                                           # (C, t)
        xb = x.astype(jnp.bfloat16)
        kxv = jnp.dot(wkv_ref[...], xb,                        # bf16 -> f32 acc
                      preferred_element_type=jnp.float32) + bkv_ref[...]
        k = _softplus(kxv[:cqp, :])                            # (Cqp, t) f32
        v = kxv[cqp:, :]                                       # (C,   t) f32
        # KV += K @ V^T : contract the shared lane axis directly (no .T).
        kv_ref[0] += lax.dot_general(
            k.astype(jnp.bfloat16), v.astype(jnp.bfloat16),
            (((1,), (1,)), ((), ())),
            preferred_element_type=jnp.float32)                # (Cqp, C) f32
        ks_ref[0] += jnp.sum(k, axis=-1, keepdims=True)        # (Cqp, 1) f32

    return kernel


def _out_kernel(x_ref, wq_ref, bq_ref, kvp_ref, o_ref):
    """Phase 2: out = x + (gamma*KV)^T Q / (Q^T (Ksum+eps)) per HW tile.

    kvp = [gamma*KV | Ksum+eps] so the numerator and the denominator come out
    of a single MXU call (denominator = last output row).
    """
    x = x_ref[0]                                               # (C, t)
    xb = x.astype(jnp.bfloat16)
    q = _softplus(jnp.dot(wq_ref[...], xb,
                          preferred_element_type=jnp.float32) + bq_ref[...])
    res = lax.dot_general(                                     # (C+1, t) f32
        kvp_ref[0], q.astype(jnp.bfloat16),
        (((0,), (0,)), ((), ())),
        preferred_element_type=jnp.float32)
    num = res[:-1, :]                                          # (C, t)
    den = res[-1:, :]                                          # (1, t)
    o_ref[0] = (x + num * pl.reciprocal(den, approx=True)).astype(o_ref.dtype)


def pam_module(x, wq, bq, wk, bk, wv, bv, gamma, *, eps=1e-6, hw_tile=None,
               vmem_limit_bytes=48 * 1024 * 1024):
    """PAM_Module forward.

    x: (B, C, H, W); wq/wk: (C//scale, C); bq/bk: (C//scale,);
    wv: (C, C); bv: (C,); gamma: (1,)  ->  (B, C, H, W)
    """
    B, C, H, W = x.shape
    Cq = wq.shape[0]
    N = H * W
    f32 = jnp.float32
    bf16 = jnp.bfloat16

    # ---- pad Cq up to a sublane multiple with exactly-dead rows -------------
    Cqp = max(8, ((Cq + 7) // 8) * 8)
    pad_q = Cqp - Cq

    def _pad_rows(w, b):
        w = w.astype(f32)
        b = b.astype(f32)
        if pad_q:
            w = jnp.concatenate([w, jnp.zeros((pad_q, C), f32)], axis=0)
            # softplus(-1e30) == 0 exactly -> padded K/Q rows are exactly zero.
            b = jnp.concatenate([b, jnp.full((pad_q,), -1e30, f32)], axis=0)
        return w, b

    wq_p, bq_p = _pad_rows(wq, bq)
    wk_p, bk_p = _pad_rows(wk, bk)

    # ---- lane-dense HW tile derived from the VMEM budget --------------------
    if hw_tile is None:
        fixed1 = 2 * (Cqp + C) * C * 2 + 2 * Cqp * C * 4    # [Wk;Wv] bf16 + KV acc
        fixed2 = 2 * Cqp * C * 2 + 2 * Cqp * (C + 1) * 2    # Wq bf16 + KV' bf16
        avail = vmem_limit_bytes - max(fixed1, fixed2) - (4 << 20)   # slack
        # phase 2 streams x in + out => ~16*C*t bytes of double-buffered VMEM.
        t = max(128, (avail // (16 * C)) // 128 * 128)
    else:
        t = max(128, (int(hw_tile) // 128) * 128)
    t = min(t, pl.cdiv(N, 128) * 128)
    n_hw = pl.cdiv(N, t)
    n_pad = n_hw * t

    x_flat = x.reshape(B, C, N)
    if n_pad != N:
        # TODO(synk): the ragged tail is handled via zero-pad + an exact
        # analytic correction; an in-kernel ragged tile would save an HBM pass.
        x_flat = jnp.pad(x_flat, ((0, 0), (0, 0), (0, n_pad - N)))

    wkv = jnp.concatenate([wk_p, wv.astype(f32)], axis=0).astype(bf16)
    bkv = jnp.concatenate([bk_p, bv.astype(f32)], axis=0).reshape(Cqp + C, 1)

    params1 = pltpu.CompilerParams(
        dimension_semantics=("parallel", "arbitrary"),
        vmem_limit_bytes=vmem_limit_bytes)
    params2 = pltpu.CompilerParams(
        dimension_semantics=("parallel", "parallel"),
        vmem_limit_bytes=vmem_limit_bytes)

    # ---- phase 1: KV (B, Cqp, C) and Ksum (B, Cqp, 1) ------------------------
    kv, ksum = pl.pallas_call(
        _make_kv_kernel(Cqp),
        out_shape=(jax.ShapeDtypeStruct((B, Cqp, C), f32),
                   jax.ShapeDtypeStruct((B, Cqp, 1), f32)),
        grid_spec=pltpu.PrefetchScalarGridSpec(
            num_scalar_prefetch=0,
            grid=(B, n_hw),
            in_specs=[
                pl.BlockSpec((1, C, t), lambda b, j: (b, 0, j)),       # x tile
                pl.BlockSpec((Cqp + C, C), lambda b, j: (0, 0)),       # [Wk;Wv]
                pl.BlockSpec((Cqp + C, 1), lambda b, j: (0, 0)),       # [bk;bv]
            ],
            out_specs=[
                pl.BlockSpec((1, Cqp, C), lambda b, j: (b, 0, 0)),     # KV acc
                pl.BlockSpec((1, Cqp, 1), lambda b, j: (b, 0, 0)),     # Ksum acc
            ],
        ),
        compiler_params=params1,
    )(x_flat, wkv, bkv)

    # Exact analytic correction for the zero-padded columns: in-kernel each
    # padded column contributes bf16(softplus(bk)) (x) bf16(bv) to KV and
    # f32 softplus(bk) to Ksum.
    if n_pad != N:
        p = jnp.float32(n_pad - N)
        spk = _softplus(bk_p)                                   # (Cqp,) f32
        spk_b = spk.astype(bf16).astype(f32)
        bv_b = bv.astype(f32).astype(bf16).astype(f32)
        kv = kv - p * spk_b[None, :, None] * bv_b[None, None, :]
        ksum = ksum - p * spk[None, :, None]

    # Fold gamma and the normalizer row into one (B, Cqp, C+1) bf16 operand.
    g = gamma.astype(f32).reshape(())
    kvp = jnp.concatenate([g * kv, ksum + jnp.float32(eps)],
                          axis=-1).astype(bf16)

    # ---- phase 2: out = x + num / den per lane-dense HW tile ----------------
    out_flat = pl.pallas_call(
        _out_kernel,
        out_shape=jax.ShapeDtypeStruct((B, C, n_pad), x.dtype),
        grid_spec=pltpu.PrefetchScalarGridSpec(
            num_scalar_prefetch=0,
            grid=(B, n_hw),
            in_specs=[
                pl.BlockSpec((1, C, t), lambda b, j: (b, 0, j)),        # x tile
                pl.BlockSpec((Cqp, C), lambda b, j: (0, 0)),            # Wq
                pl.BlockSpec((Cqp, 1), lambda b, j: (0, 0)),            # bq
                pl.BlockSpec((1, Cqp, C + 1), lambda b, j: (b, 0, 0)),  # KV'
            ],
            out_specs=pl.BlockSpec((1, C, t), lambda b, j: (b, 0, j)),
        ),
        compiler_params=params2,
    )(x_flat, wq_p.astype(bf16), bq_p.reshape(Cqp, 1), kvp)

    if n_pad != N:
        out_flat = out_flat[:, :, :N]
    return out_flat.reshape(B, C, H, W)


def _pam_ref(x, wq, bq, wk, bk, wv, bv, gamma, eps=1e-6):
    B, C, H, W = x.shape
    N = H * W
    xf = x.reshape(B, C, N).astype(jnp.float32)
    Q = _softplus(jnp.einsum("oc,bcn->bon", wq, xf) + bq[None, :, None])
    K = _softplus(jnp.einsum("oc,bcn->bon", wk, xf) + bk[None, :, None])
    V = jnp.einsum("oc,bcn->bon", wv, xf) + bv[None, :, None]
    KV = jnp.einsum("bmn,bcn->bmc", K, V)
    denom = jnp.einsum("bmn,bm->bn", Q, jnp.sum(K, axis=-1) + eps)
    weight_value = jnp.einsum("bmn,bmc->bcn", Q, KV) / denom[:, None, :]
    out = xf + gamma[0] * weight_value
    return out.reshape(B, C, H, W).astype(x.dtype)


if __name__ == "__main__":
    key = jax.random.PRNGKey(0)
    B, C, H, W = 2, 32, 16, 16
    scale = 8
    Cq = C // scale
    ks = jax.random.split(key, 8)

    x = jax.random.normal(ks[0], (B, C, H, W), dtype=jnp.float32)
    # 1x1 convs == channel matmuls; PyTorch-default-like uniform(+-1/sqrt(C)).
    s_in = 1.0 / (C ** 0.5)
    wq = jax.random.uniform(ks[1], (Cq, C), jnp.float32, -s_in, s_in)
    bq = jax.random.uniform(ks[2], (Cq,), jnp.float32, -s_in, s_in)
    wk = jax.random.uniform(ks[3], (Cq, C), jnp.float32, -s_in, s_in)
    bk = jax.random.uniform(ks[4], (Cq,), jnp.float32, -s_in, s_in)
    wv = jax.random.uniform(ks[5], (C, C), jnp.float32, -s_in, s_in)
    bv = jax.random.uniform(ks[6], (C,), jnp.float32, -s_in, s_in)
    gamma = jnp.array([0.5], dtype=jnp.float32)   # nonzero: exercise attention

    ref = _pam_ref(x, wq, bq, wk, bk, wv, bv, gamma)

    # multi-tile accumulation path (hw_tile=128 -> two 128-wide HW tiles)
    out = jax.block_until_ready(
        pam_module(x, wq, bq, wk, bk, wv, bv, gamma, hw_tile=128))
    assert out.shape == x.shape
    assert bool(jnp.all(jnp.isfinite(out)))
    assert jnp.allclose(out, ref, atol=5e-3, rtol=5e-3), \
        float(jnp.max(jnp.abs(out - ref)))

    # default (VMEM-budget-derived) tile path: single 256-wide tile here
    out_d = jax.block_until_ready(pam_module(x, wq, bq, wk, bk, wv, bv, gamma))
    assert jnp.allclose(out_d, ref, atol=5e-3, rtol=5e-3), \
        float(jnp.max(jnp.abs(out_d - ref)))

    # ragged / padded path (N = 120 -> one 128-wide tile with 8 pad columns,
    # exercises the analytic padding correction)
    x2 = jax.random.normal(ks[7], (B, C, 10, 12), dtype=jnp.float32)
    out2 = jax.block_until_ready(pam_module(x2, wq, bq, wk, bk, wv, bv, gamma))
    ref2 = _pam_ref(x2, wq, bq, wk, bk, wv, bv, gamma)
    assert jnp.allclose(out2, ref2, atol=5e-3, rtol=5e-3), \
        float(jnp.max(jnp.abs(out2 - ref2)))

    # gamma = 0 (the module's Parameter init) must reduce to identity exactly
    g0 = jnp.zeros((1,), dtype=jnp.float32)
    out0 = jax.block_until_ready(pam_module(x, wq, bq, wk, bk, wv, bv, g0))
    assert jnp.allclose(out0, x, atol=1e-6, rtol=1e-6)

    print("KERNEL_OK")
</pallas_src>

<mosaic_0001>
module attributes {stable_mosaic.version = 11 : i64} {
  func.func @kernel(%arg0: i32, %arg1: i32, %arg2: memref<1x32x128xf32, #tpu.memory_space<vmem>>, %arg3: memref<40x32xbf16, #tpu.memory_space<vmem>>, %arg4: memref<40x1xf32, #tpu.memory_space<vmem>>, %arg5: memref<1x8x32xf32, #tpu.memory_space<vmem>>, %arg6: memref<1x8x1xf32, #tpu.memory_space<vmem>>) attributes {dimension_semantics = [#tpu.dimension_semantics<parallel>, #tpu.dimension_semantics<arbitrary>], iteration_bounds = array<i64: 2, 2>, scalar_prefetch = 0 : i64, scratch_operands = 0 : i64, tpu.core_type = #tpu.core_type<tc>, window_params = [{transform_indices = @transform_0, window_bounds = array<i64: 1, 32, 128>}, {pipeline_mode = #tpu.pipeline_mode<synchronous>, transform_indices = @transform_1, window_bounds = array<i64: 40, 32>}, {pipeline_mode = #tpu.pipeline_mode<synchronous>, transform_indices = @transform_2, window_bounds = array<i64: 40, 1>}, {transform_indices = @transform_3, window_bounds = array<i64: 1, 8, 32>}, {transform_indices = @transform_4, window_bounds = array<i64: 1, 8, 1>}]} {
    %c0_i32 = arith.constant 0 : i32
    %0 = arith.cmpi eq, %arg1, %c0_i32 : i32
    %1 = arith.extui %0 : i1 to i32
    %c0_i32_0 = arith.constant 0 : i32
    %2 = arith.cmpi ne, %1, %c0_i32_0 : i32
    scf.if %2 {
      %cst_24 = arith.constant 0.000000e+00 : f32
      %40 = vector.broadcast %cst_24 : f32 to vector<1x8x32xf32>
      %c0_25 = arith.constant 0 : index
      %c0_26 = arith.constant 0 : index
      %c0_27 = arith.constant 0 : index
      %41 = vector.load %arg5[%c0_25, %c0_26, %c0_27] : memref<1x8x32xf32, #tpu.memory_space<vmem>>, vector<1x8x32xf32>
      tpu.vector_store %arg5[%c0_25, %c0_26, %c0_27], %40 {strides = array<i32>} : memref<1x8x32xf32, #tpu.memory_space<vmem>>, vector<1x8x32xf32>,
      %cst_28 = arith.constant 0.000000e+00 : f32
      %42 = vector.broadcast %cst_28 : f32 to vector<1x8x1xf32>
      %c0_29 = arith.constant 0 : index
      %c0_30 = arith.constant 0 : index
      %c0_31 = arith.constant 0 : index
      %43 = vector.load %arg6[%c0_29, %c0_30, %c0_31] : memref<1x8x1xf32, #tpu.memory_space<vmem>>, vector<1x8x1xf32>
      tpu.vector_store %arg6[%c0_29, %c0_30, %c0_31], %42 {strides = array<i32>} : memref<1x8x1xf32, #tpu.memory_space<vmem>>, vector<1x8x1xf32>,
    } else {
    }
    %c0 = arith.constant 0 : index
    %c0_1 = arith.constant 0 : index
    %c0_2 = arith.constant 0 : index
    %3 = vector.load %arg2[%c0, %c0_1, %c0_2] : memref<1x32x128xf32, #tpu.memory_space<vmem>>, vector<1x32x128xf32>
    %4 = vector.shape_cast %3 : vector<1x32x128xf32> to vector<32x128xf32>
    %5 = arith.truncf %4 : vector<32x128xf32> to vector<32x128xbf16>
    %c0_3 = arith.constant 0 : index
    %c0_4 = arith.constant 0 : index
    %6 = vector.load %arg3[%c0_3, %c0_4] : memref<40x32xbf16, #tpu.memory_space<vmem>>, vector<40x32xbf16>
    %cst = arith.constant dense<0.000000e+00> : vector<40x128xf32>
    %7 = tpu.matmul %6, %5, %cst {dimension_numbers = #tpu.dot_dimension_numbers<[1], [0], [0], [1], [0, 0, 1, 1], [], []>} : vector<40x32xbf16>, vector<32x128xbf16>, vector<40x128xf32> -> vector<40x128xf32>
    %c0_5 = arith.constant 0 : index
    %c0_6 = arith.constant 0 : index
    %8 = vector.load %arg4[%c0_5, %c0_6] : memref<40x1xf32, #tpu.memory_space<vmem>>, vector<40x1xf32>
    %9 = vector.broadcast %8 : vector<40x1xf32> to vector<40x128xf32>
    %10 = arith.addf %7, %9 : vector<40x128xf32>
    %11 = vector.extract_strided_slice %10 {offsets = [0, 0], sizes = [8, 128], strides = [1, 1]} : vector<40x128xf32> to vector<8x128xf32>
    %cst_7 = arith.constant 0.000000e+00 : f32
    %12 = vector.broadcast %cst_7 : f32 to vector<8x128xf32>
    %13 = arith.maximumf %11, %12 : vector<8x128xf32>
    %14 = math.absf %11 : vector<8x128xf32>
    %cst_8 = arith.constant 0.000000e+00 : f32
    %15 = vector.broadcast %cst_8 : f32 to vector<8x128xf32>
    %16 = arith.subf %15, %14 : vector<8x128xf32>
    %17 = math.exp %16 : vector<8x128xf32>
    %cst_9 = arith.constant 1.000000e+00 : f32
    %18 = vector.broadcast %cst_9 : f32 to vector<8x128xf32>
    %19 = arith.addf %18, %17 : vector<8x128xf32>
    %20 = math.log %19 : vector<8x128xf32>
    %21 = arith.addf %13, %20 : vector<8x128xf32>
    %22 = vector.extract_strided_slice %10 {offsets = [8, 0], sizes = [32, 128], strides = [1, 1]} : vector<40x128xf32> to vector<32x128xf32>
    %c0_10 = arith.constant 0 : index
    %c0_11 = arith.constant 0 : index
    %c0_12 = arith.constant 0 : index
    %23 = vector.load %arg5[%c0_10, %c0_11, %c0_12] : memref<1x8x32xf32, #tpu.memory_space<vmem>>, vector<1x8x32xf32>
    %24 = vector.shape_cast %23 : vector<1x8x32xf32> to vector<8x32xf32>
    %25 = arith.truncf %21 : vector<8x128xf32> to vector<8x128xbf16>
    %26 = arith.truncf %22 : vector<32x128xf32> to vector<32x128xbf16>
    %cst_13 = arith.constant dense<0.000000e+00> : vector<8x32xf32>
    %27 = tpu.matmul %25, %26, %cst_13 {dimension_numbers = #tpu.dot_dimension_numbers<[1], [1], [0], [0], [0, 0, 1, 0], [], []>} : vector<8x128xbf16>, vector<32x128xbf16>, vector<8x32xf32> -> vector<8x32xf32>
    %28 = arith.addf %24, %27 : vector<8x32xf32>
    %c0_14 = arith.constant 0 : index
    %c0_15 = arith.constant 0 : index
    %c0_16 = arith.constant 0 : index
    %29 = vector.load %arg5[%c0_14, %c0_15, %c0_16] : memref<1x8x32xf32, #tpu.memory_space<vmem>>, vector<1x8x32xf32>
    %30 = vector.shape_cast %29 : vector<1x8x32xf32> to vector<8x32xf32>
    %31 = vector.shape_cast %28 : vector<8x32xf32> to vector<1x8x32xf32>
    tpu.vector_store %arg5[%c0_14, %c0_15, %c0_16], %31 {strides = array<i32>} : memref<1x8x32xf32, #tpu.memory_space<vmem>>, vector<1x8x32xf32>,
    %c0_17 = arith.constant 0 : index
    %c0_18 = arith.constant 0 : index
    %c0_19 = arith.constant 0 : index
    %32 = vector.load %arg6[%c0_17, %c0_18, %c0_19] : memref<1x8x1xf32, #tpu.memory_space<vmem>>, vector<1x8x1xf32>
    %33 = vector.shape_cast %32 : vector<1x8x1xf32> to vector<8x1xf32>
    %cst_20 = arith.constant dense<0.000000e+00> : vector<8xf32>
    %34 = vector.multi_reduction <add>, %21, %cst_20 [1] : vector<8x128xf32> to vector<8xf32>
    %35 = vector.shape_cast %34 : vector<8xf32> to vector<8x1xf32>
    %36 = arith.addf %33, %35 : vector<8x1xf32>
    %c0_21 = arith.constant 0 : index
    %c0_22 = arith.constant 0 : index
    %c0_23 = arith.constant 0 : index
    %37 = vector.load %arg6[%c0_21, %c0_22, %c0_23] : memref<1x8x1xf32, #tpu.memory_space<vmem>>, vector<1x8x1xf32>
    %38 = vector.shape_cast %37 : vector<1x8x1xf32> to vector<8x1xf32>
    %39 = vector.shape_cast %36 : vector<8x1xf32> to vector<1x8x1xf32>
    tpu.vector_store %arg6[%c0_21, %c0_22, %c0_23], %39 {strides = array<i32>} : memref<1x8x1xf32, #tpu.memory_space<vmem>>, vector<1x8x1xf32>,
    return
  }
  func.func @transform_0(%arg0: i32, %arg1: i32) -> (i32, i32, i32) {
    %c0_i32 = arith.constant 0 : i32
    %c0_i32_0 = arith.constant 0 : i32
    return %arg0, %c0_i32, %arg1 : i32, i32, i32
  }
  func.func @transform_1(%arg0: i32, %arg1: i32) -> (i32, i32) {
    %c0_i32 = arith.constant 0 : i32
    %c0_i32_0 = arith.constant 0 : i32
    %c0_i32_1 = arith.constant 0 : i32
    return %c0_i32, %c0_i32_0 : i32, i32
  }
  func.func @transform_2(%arg0: i32, %arg1: i32) -> (i32, i32) {
    %c0_i32 = arith.constant 0 : i32
    %c0_i32_0 = arith.constant 0 : i32
    %c0_i32_1 = arith.constant 0 : i32
    return %c0_i32, %c0_i32_0 : i32, i32
  }
  func.func @transform_3(%arg0: i32, %arg1: i32) -> (i32, i32, i32) {
    %c0_i32 = arith.constant 0 : i32
    %c0_i32_0 = arith.constant 0 : i32
    %c0_i32_1 = arith.constant 0 : i32
    return %arg0, %c0_i32, %c0_i32_0 : i32, i32, i32
  }
  func.func @transform_4(%arg0: i32, %arg1: i32) -> (i32, i32, i32) {
    %c0_i32 = arith.constant 0 : i32
    %c0_i32_0 = arith.constant 0 : i32
    %c0_i32_1 = arith.constant 0 : i32
    return %arg0, %c0_i32, %c0_i32_0 : i32, i32, i32
  }
}

</mosaic_0001>

<bundles_post_ra>
// kernel: tpu_custom_call.1
= control target key start
LH: loop header
LB: loop body
LE: loop exit
PB: predicated region body
PF: predicated region fallthrough
CT: control target
= control target key end

     0   :  { %10 = vsyncpa [#allocation3], 0  ;;  %s1190_s0 = inlined_call_operand.hbm [shape: f32[2,32,256], index: 0, kind: input, shape index: {}]   ;;  %s1191_s1 = inlined_call_operand.vmem [shape: bf16[40,32], index: 1, kind: input, shape index: {}]   ;;  %s1192_s2 = inlined_call_operand.vmem [shape: f32[40,1], index: 2, kind: input, shape index: {}]   ;;  %s1193_s3 = inlined_call_operand.hbm [shape: f32[2,8,32], index: 3, kind: output, shape index: {0}]   ;;  %s1194_s4 = inlined_call_operand.vmem [shape: f32[2,8,1], index: 4, kind: output, shape index: {1}]  }
   0x1   :  { %12 = vsyncpa [#allocation3 + $0x1], 0 }
   0x2   :  { %13 = vsyncpa [#allocation4], 0 }
   0x3   :  { %15 = vsyncpa [#allocation4 + $0x1], 0  ;;  %s920_s15 = smov 0   ;;  %s922_s16 = smov 0  }
   0x4   :  { %s924_s17 = smov 0   ;;  %s926_s18 = smov 0  }
   0x5   :  { %s928_s19 = smov 0   ;;  %s930_s20 = smov 0  }
   0x6   :  { %s932_s21 = smov 0   ;;  %s934_s22 = smov 0  }
   0x7   :  { %s936_s23 = smov 0   ;;  %s938_s24 = smov 0  }
   0x8   :  { %s940_s25 = smov 0  }
   0x9 LB: > { %s560_s26 = sadd.s32 4294967295, %s884_s25   ;;  %s561_s27 = sadd.s32 4294967294, %s884_s25   ;;  %s884_s25 = sphi %s940_s25, %s21_s25   ;;  %s880_s24 = sphi %s938_s24, %s1220_s24   ;;  %s876_s23 = sphi %s936_s23, %s1219_s23   ;;  %s872_s22 = sphi %s934_s22, %s1218_s22   ;;  %s868_s21 = sphi %s932_s21, %s1217_s21   ;;  %s864_s20 = sphi %s930_s20, %s1216_s20   ;;  %s860_s19 = sphi %s928_s19, %s1215_s19   ;;  %s856_s18 = sphi %s926_s18, %s1214_s18   ;;  %s852_s17 = sphi %s924_s17, %s1213_s17   ;;  %s848_s16 = sphi %s922_s16, %s1212_s16   ;;  %s844_s15 = sphi %s920_s15, %s1211_s15  }
   0xa   : > { %s30_s28 = sadd.s32 1, %s876_s23  ;;  %s33_s29 = sadd.s32 1, %s880_s24 }
   0xb   : > { %p31_p0 = scmp.ge.s32.totalorder %s30_s28, 2  ;;  %s42_s30 = sadd.s32 1, %s864_s20 }
   0xc   : > { %p49_p1 = scmp.ne.s32.totalorder %s864_s20, %s860_s19  ;;  %p50_p2 = scmp.eq.s32.totalorder %s884_s25, 0 }
   0xd   : > { %s1222_s28 = smov (%p31_p0, %s30_s28), 0  ;;  %s1224_s29 = smov (!%p31_p0, %s33_s29), %s880_s24 }
   0xe   : > { %1198 = sst [smem:[#allocation8_spill]] %s1222_s28  ;;  %s38_s5 = ssub.s32 %s876_s23, %s1222_s28 }
   0xf   : > { %p986_p3 = por %p50_p2, %p49_p1  ;;  %p35_p4 = scmp.ge.s32.totalorder %s1224_s29, 2 }
  0x10   : > { %p55_p5 = scmp.ne.s32.totalorder %s860_s19, %s856_s18  ;;  %p56_p6 = scmp.eq.s32.totalorder %s560_s26, 0 }
  0x11   : > { %s110_s7 = sadd.s32 1, %s852_s17  ;;  %s1226_s29 = smov (%p35_p4, %s1224_s29), 0 }
  0x12   : > { %1200 = sst [smem:[#allocation9_spill]] %s1226_s29  ;;  %p994_p7 = por %p56_p6, %p55_p5 }
  0x13   : > { %p120_p8 = scmp.ne.s32.totalorder %s852_s17, %s848_s16  ;;  %s37_s9 = ssub.s32 %s880_s24, %s1226_s29 }
  0x14   : > { %p121_p9 = scmp.eq.s32.totalorder %s560_s26, 3  ;;  %s39_s10 = sor.u32 %s38_s5, %s37_s9 }
  0x15   : > { %p108_p10 = scmp.eq.s32.totalorder %s37_s9, 0  ;;  %p40_p11 = scmp.eq.s32.totalorder %s39_s10, 0 }
  0x16   : > { %p1002_p12 = por %p121_p9, %p120_p8  ;;  %p126_p13 = scmp.ne.s32.totalorder %s848_s16, %s844_s15 }
  0x17   : > { %s1007_s12 = scalar_select %p108_p10, %s852_s17, %s110_s7  }
  0x18   : > { %s1202_s11 = scalar_select %p1002_p12, 1, 0 }
  0x19   : > { %1203 = sst [smem:[#allocation10_spill]] %s1007_s12  ;;  %p127_p0 = scmp.eq.s32.totalorder %s561_s27, 3 }
  0x1a   : > { %s1010_s13 = scalar_select %p40_p11, %s864_s20, %s42_s30  }
  0x1b   : > { %p626_p1 = scmp.lt.s32.totalorder %s884_s25, 4  ;;  %p1015_p2 = por %p127_p0, %p126_p13 }
  0x1c   : > { %s179_s18 = sand.u32 1, %s864_s20   ;;  %s565_s5 = sshll.u32 %s880_s24, 3 }
  0x1d   : > { %s1204_s14 = scalar_select %p1015_p2, 1, 0 }
  0x1e   : > { %s564_s26 = sshll.u32 %s179_s18, 5  ;;  %s188_s9 = sadd.s32 %s876_s23, %s565_s5 }
  0x1f   : > { %s183_s10 = scalar_lea.vmem [#allocation2], %s564_s26  ;;  %s566_s28 = sshll.u32 %s188_s9, 7 }
  0x20   : > { %s191_s29 = sshll.u32 %s183_s10, 4  ;;  %s1027_s30 = scalar_lea.hbm %s1190_s0, %s566_s28  ;;  %s1022_s29 = int_to_ptr.vmem [resolvable:$true] %s191_s29 }
  0x21   : > { %p1031_p4 = pnand %p626_p1, %p986_p3  ;;  %s1035_s26 = scalar_lea.sflag [#allocation3], %s179_s18 }
  0x22   : > { %s732_s5 = scalar_lea.hbm %s1027_s30, 512  ;;  %s737_s12 = scalar_lea.hbm %s1190_s0, 2048 }
  0x23   : > { %p733_p5 = scmp.ne.s32.totalorder %s1027_s30, %s732_s5  ;;  %p734_p6 = pneg %p1031_p4 }
  0x24   : > { %p738_p3 = scmp.lt.u32.totalorder %s1027_s30, %s1190_s0  ;;  %p739_p10 = scmp.lt.u32.totalorder %s737_s12, %s732_s5 }
  0x25   : > { %p735_p8 = pnand %p734_p6, %p733_p5  ;;  %p741_p13 = scmp.lt.u32.totalorder %s732_s5, %s1027_s30 }
  0x26   : > { %p740_p11 = por %p739_p10, %p738_p3 }
  0x27   : > { %p736_p9 = pneg %p735_p8 }
  0x28   : > { %p742_p0 = por %p741_p13, %p740_p11 }
  0x2a   : > { %p743_p1 = pnand %p742_p0, %p736_p9 }
  0x2c   : > { %746 = shalt.err (!%p743_p1)
}
  0x2d   : > { %s747_s18 = scalar_lea.vmem %s1022_s29, 512  ;;  %s886_s7 = smov [#allocation2]  }
  0x2e   : > { %p748_p5 = scmp.ne.s32.totalorder %s1022_s29, %s747_s18  ;;  %s752_s28 = sshll.u32 %s886_s7, 4  ;;  %s753_s28 = int_to_ptr.vmem [resolvable:$false] %s752_s28 }
  0x2f   : > { %s754_s6 = scalar_lea.vmem %s753_s28, 1024  ;;  %p755_p12 = scmp.lt.s32.totalorder %s1022_s29, %s753_s28 }
  0x30   : > { %p750_p8 = pnand %p748_p5, %p734_p6  ;;  %p756_p3 = scmp.lt.s32.totalorder %s754_s6, %s747_s18 }
  0x32   : > { %p751_p2 = pneg %p750_p8  ;;  %p757_p10 = por %p756_p3, %p755_p12 }
  0x34   : > { %p758_p11 = pnand %p757_p10, %p751_p2 }
  0x36   : > { %761 = shalt.err (!%p758_p11)
}
  0x37   : > { %s887_s5 = smov 256   ;;  %s888_s12 = smov 128  }
  0x38   : > { %s889_s9 = smov 8   ;;  %p567_p6 = scmp.ge.s32.totalorder %s884_s25, 1 }
  0x39   : > { %621 = dma.hbm_to_vmem [thread:$0]  (!%p1031_p4), %s1027_s30, 512, %s1022_s29, %s1035_s26, %s887_s5, %s888_s12, %s889_s9  }
  0x3a   : > { %p199_p9 = scmp.lt.s32.totalorder %s884_s25, 5 }
  0x3c   : > { %p200_p13 = pnand %p567_p6, %p199_p9 }
  0x3d   : > { %s205_s10 = sand.u32 (!%p200_p13), 1, %s860_s19  }
  0x3e   : > { %203 = sbr.rel (%p200_p13) target bundleno = 568 (0x238), region = 32  ;;  %s568_s18 = sshll.u32 (!%p200_p13), %s205_s10, 5 }
  0x3f   : > { %s206_s7 = scalar_lea.sflag (!%p200_p13), [#allocation3], %s205_s10  ;;  %s209_s28 = scalar_lea.vmem (!%p200_p13), [#allocation2], %s568_s18 }
  0x45   : > { %835 = dma.done.wait (%p994_p7), %s206_s7, 512  }
  0x46   : > { %837 = vsyncadd (%p994_p7), %s206_s7, 4294966784  ;;  %s229_s29 = sand.u32 1, %s848_s16   ;;  %p238_p12 = scmp.lt.s32.totalorder %s872_s22, 1 }
  0x47   : > { %s569_s30 = sshll.u32 %s229_s29, 3  ;;  %p571_p2 = scmp.ne.s32.totalorder %s868_s21, 0 }
  0x48   : > { %s239_s27 = scalar_select %p238_p12, %s872_s22, 1 }
  0x49   : > { %s1080_s9 = scalar_lea.vmem [#allocation5], %s569_s30  ;;  %246 = sbr.rel (%p571_p2) target bundleno = 80 (0x50), region = 40  ;;  %vm247_vm0 = vcmask (!%p571_p2), 261120   ;;  %vm249_vm1 = vcmask (!%p571_p2), 7168   ;;  %v890_v0 = vmov (!%p571_p2), 0.0  }
  0x4a   : > { %s570_s26 = sshll.u32 %s239_s27, 3  ;;  %248 = vst.msk [vmem:[%s1080_s9] sm:$0xff] (!%p571_p2), %vm247_vm0, %v890_v0 }
  0x4b   : > { %s1078_s12 = scalar_lea.vmem %s1194_s4, %s570_s26 }
  0x4c   : > { %250 = vst.msk [vmem:[%s1078_s12] sm:$0xff] (!%p571_p2), %vm249_vm1, %v890_v0 }
  0x50 PF: > { %v251_v1 = vld [vmem:[%s209_s28] sm:$0xff]  ;;  %v252_v2 = vld [vmem:[%s209_s28 + $0x8] sm:$0xff]  ;;  %v253_v3 = vld [vmem:[%s209_s28 + $0x10] sm:$0xff]  ;;  %v891_v4 = vmov 0.0   ;;  %vm892_vm2 = vmmov 0   ;;  %v893_v7 = vmov 0  }
  0x51   : > { %590 = vmatprep.subr.bf16.mxu0 %v891_v4  ;;  %v255_v5 = vpack.c.bf16 %v252_v2, %v251_v1  ;;  %v254_v6 = vld [vmem:[%s209_s28 + $0x18] sm:$0xff]  ;;  %594 = vmatprep.mubr.msk.bf16.mxu0 %vm892_vm2, %v891_v4  ;;  %v262_v9 = vld [vmem:[%s1192_s2] sm:$0xff]  ;;  %v264_v10 = vld [vmem:[%s1192_s2 + $0x10] sm:$0xff]  ;;  %vm305_vm3 = vcmask 261120   ;;  %vm430_vm4 = vcmask 7168   ;;  %s579_s28 = sshll.u32 %s872_s22, 7 }
  0x52   : > { %723 = vset.pattern.permute.xlu0 %v893_v7  ;;  %724 = vset.pattern.permute.xlu1 %v893_v7  ;;  %v256_v8 = vpack.c.bf16 %v254_v6, %v253_v3  ;;  %v725_v11 = vld [vmem:[%s1191_s1] sm:$0xff]   ;;  %v263_v12 = vld [vmem:[%s1192_s2 + $0x8] sm:$0xff]  ;;  %v265_v13 = vld [vmem:[%s1192_s2 + $0x18] sm:$0xff]  ;;  %s450_s30 = sshll.u32 %s1080_s9, 4  ;;  %s1124_s6 = scalar_lea.hbm %s1193_s3, %s579_s28  ;;  %s1126_s30 = int_to_ptr.vmem [resolvable:$true] %s450_s30 }
  0x53   : > { %591 = vmatpush3.bf16.msra.mxu0 %v255_v5  ;;  %606 = vmatprep.subr.bf16.mxu1 %v891_v4  ;;  %v266_v14 = vld [vmem:[%s1192_s2 + $0x20] sm:$0xff]  ;;  %v726_v15 = vld [vmem:[%s1191_s1 + $0x8] sm:$0xff]   ;;  %v727_v16 = vld [vmem:[%s1191_s1 + $0x10] ss:$0 sps:$4 sm:$0xff]   ;;  %s433_s22 = scalar_lea.sflag [#allocation4], %s229_s29  ;;  %p1206_p4 = scmp.ne.s32.totalorder %s1202_s11, 0 }
  0x54   : > { %592 = vmatprep.subr.bf16.mxu0 %v891_v4  ;;  %610 = vmatprep.mubr.msk.bf16.mxu1 %vm892_vm2, %v891_v4  ;;  %v426_v51 = vld [vmem:[%s1078_s12] sm:$0xff]  ;;  %s894_s5 = smov [#allocation5]  }
  0x55   : > { %269 = vperm.xlu0 %723, %v262_v9   ;;  %279 = vperm.xlu1 %724, %v264_v10   ;;  %v380_v54 = vld [vmem:[%s1080_s9] sm:$0xff]  ;;  %s766_s21 = sshll.u32 %s894_s5, 4  ;;  %s767_s21 = int_to_ptr.vmem [resolvable:$false] %s766_s21 }
  0x56   : > { %s768_s8 = scalar_lea.vmem %s767_s21, 256  ;;  %p769_p5 = scmp.lt.s32.totalorder %s1126_s30, %s767_s21 }
  0x57   : > { %593 = vmatpush3.bf16.msra.mxu0 %v256_v8 }
  0x59   : > { %274 = vperm.xlu0 %723, %v263_v12   ;;  %284 = vperm.xlu1 %724, %v265_v13  }
  0x5a   : > { %595 = vmatmul.mubr.msk.bf16.vlgmr.msra.gmra.mrb[0].mxu0 %vm305_vm3, %v725_v11 }
  0x5b   : > { %598 = vmatprep.mubr.msk.bf16.mxu0 %vm892_vm2, %v891_v4 }
  0x5d   : > { %289 = vperm.xlu0 %723, %v266_v14  }
  0x62   : > { %599 = vmatmul.mubr.msk.bf16.gmra.mrb[4].mxu0 %vm305_vm3, %v726_v15 }
  0x63   : > { %602 = vmatprep.mubr.msk.bf16.mxu0 %vm892_vm2, %v891_v4 }
  0x6a   : > { %603 = vmatmul.mubr.msk.bf16.gmra.mrb[8].mxu0 %vm305_vm3, %v727_v16 }
  0xd4   : > { %v270_v17 = vpop.permute.xlu0 %269  ;;  %v280_v25 = vpop.permute.xlu1 %279 }
  0xd8   : > { %v275_v27 = vpop.permute.xlu0 %274  ;;  %v285_v35 = vpop.permute.xlu1 %284 }
  0xdc   : > { %v290_v37 = vpop.permute.xlu0 %289 }
 0x12d   : > { %v349_v18 = vpop.f32.mrb[0].mxu0 }
 0x12e   : > { %v350_v19 = vadd.f32 %v349_v18, %v270_v17  ;;  %v596_v20 = vpop.f32.mrb[1].mxu0 }
 0x12f   : > { %v352_v21 = vpop.f32.mrb[2].mxu0 }
 0x130   : > { %v372_v22 = vand.u32 2147483647, %v350_v19  ;;  %v597_v23 = vpop.f32.mrb[3].mxu0  ;;  %v353_v29 = vadd.f32 %v352_v21, %v275_v27  ;;  %v371_v47 = vmax.f32 %v350_v19, 0.0 }
 0x132   : > { %v373_v24 = vsub.f32 0.0, %v372_v22 }
 0x134   : > { %v374_v26 = vmul.f32 1.442695, %v373_v24 }
 0x135   : > { %v357_v28 = vpop.f32.mrb[4].mxu0 }
 0x136   : > { %728 = vpow2.f32 %v374_v26  ;;  %v358_v30 = vadd.f32 %v357_v28, %v280_v25  ;;  %v600_v31 = vpop.f32.mrb[5].mxu0 }
 0x137   : > { %v360_v32 = vpop.f32.mrb[6].mxu0 }
 0x138   : > { %v382_v33 = vpack.c.bf16 %v358_v30, %v353_v29  ;;  %v601_v34 = vpop.f32.mrb[7].mxu0  ;;  %v361_v36 = vadd.f32 %v360_v32, %v285_v35 }
 0x13a   : > { %607 = vmatpush3.bf16.xpose.msra.mxu1 %v382_v33 }
 0x13b   : > { %608 = vmatprep.subr.bf16.mxu1 %v891_v4 }
 0x13d   : > { %v365_v38 = vpop.f32.mrb[8].mxu0 }
 0x13e   : > { %v366_v39 = vadd.f32 %v365_v38, %v290_v37  ;;  %v604_v40 = vpop.f32.mrb[9].mxu0 }
 0x13f   : > { %v368_v41 = vpop.f32.mrb[10].mxu0 }
 0x140   : > { %v729_v42 = vpop.eup %728  ;;  %v383_v43 = vpack.c.bf16 %v366_v39, %v361_v36  ;;  %v605_v44 = vpop.f32.mrb[11].mxu0 }
 0x141   : > { %v376_v45 = vadd.f32 1.0, %v729_v42 }
 0x142   : > { %609 = vmatpush3.bf16.xpose.msra.mxu1 %v383_v43 }
 0x143   : > { %730 = vlog2.f32 %v376_v45 }
 0x14d   : > { %v731_v46 = vpop.eup %730 }
 0x14e   : > { %v378_v48 = vmul.f32 0.6931472, %v731_v46 }
 0x150   : > { %v379_v49 = vadd.f32 %v378_v48, %v371_v47 }
 0x152   : > { %427 = vadd.xlane.f32.xlu1 %v379_v49  ;;  %v381_v50 = vpack.c.bf16 %v379_v49, %v379_v49 }
 0x154   : > { %611 = vmatmul.mubr.bf16.vlgmr.msra.gmra.mrb[0].mxu1 %v381_v50 }
 0x1df   : > { %v428_v52 = vpop.xlane.xlu1 %427 }
 0x1e0   : > { %v429_v53 = vadd.f32 %v428_v52, %v426_v51 }
 0x1e2   : > { %431 = vst.msk [vmem:[%s1078_s12] sm:$0xff] %vm430_vm4, %v429_v53  ;;  %s762_s12 = scalar_lea.vmem %s1126_s30, 128 }
 0x1e3   : > { %p763_p7 = scmp.ne.s32.totalorder %s1126_s30, %s762_s12  ;;  %p770_p8 = scmp.lt.s32.totalorder %s768_s8, %s762_s12 }
 0x1e5   : > { %p764_p0 = pnand %p763_p7, %p1206_p4  ;;  %p771_p3 = por %p770_p8, %p769_p5 }
 0x1e7   : > { %p765_p1 = pneg %p764_p0 }
 0x1e9   : > { %p772_p10 = pnand %p771_p3, %p765_p1 }
 0x227   : > { %v418_v55 = vpop.f32.mrb[0].mxu1 }
 0x228   : > { %v424_v56 = vadd.f32 %v418_v55, %v380_v54  ;;  %v612_v57 = vpop.f32.mrb[1].mxu1 }
 0x229   : > { %v421_v58 = vpop.f32.mrb[2].mxu1 }
 0x22a   : > { %425 = vst.msk [vmem:[%s1080_s9] sm:$0xff] %vm305_vm3, %v424_v56  ;;  %v613_v59 = vpop.f32.mrb[3].mxu1 }
 0x22b   : > { %775 = shalt.err (!%p772_p10)
}
 0x22c   : > { %s776_s29 = scalar_lea.hbm %s1124_s6, 128  ;;  %s780_s18 = scalar_lea.hbm %s1193_s3, 256 }
 0x22d   : > { %p777_p11 = scmp.ne.s32.totalorder %s1124_s6, %s776_s29  ;;  %p781_p13 = scmp.lt.u32.totalorder %s1124_s6, %s1193_s3 }
 0x22e   : > { %p782_p12 = scmp.lt.u32.totalorder %s780_s18, %s776_s29  ;;  %p784_p7 = scmp.lt.u32.totalorder %s776_s29, %s1124_s6 }
 0x22f   : > { %p778_p6 = pnand %p777_p11, %p1206_p4 }
 0x230   : > { %p783_p2 = por %p782_p12, %p781_p13 }
 0x231   : > { %p779_p9 = pneg %p778_p6 }
 0x232   : > { %p785_p0 = por %p784_p7, %p783_p2 }
 0x234   : > { %p786_p1 = pnand %p785_p0, %p779_p9 }
 0x236   : > { %789 = shalt.err (!%p786_p1)
}
 0x237   : > { %616 = dma.vmem_to_hbm [thread:$0]  (%p1206_p4), %s1126_s30, 128, %s1124_s6, %s433_s22  }
 0x238 PF: > { %p627_p5 = scmp.ge.s32.totalorder %s884_s25, 2  ;;  %s465_s27 = sand.u32 1, %s844_s15  }
 0x239   : > { %p1207_p8 = scmp.ne.s32.totalorder %s1204_s14, 0  ;;  %s466_s26 = scalar_lea.sflag [#allocation4], %s465_s27 }
 0x23b   : > { %p623_p3 = pnand %p627_p5, %p1207_p8 }
 0x23d   : > { %839 = dma.done.wait (!%p623_p3), %s466_s26, 128  }
 0x23e   : > { %841 = vsyncadd (!%p623_p3), %s466_s26, 4294967168  ;;  %s21_s25 = sadd.s32 1, %s884_s25   ;;  %s1208_s11 = sld [smem:[#allocation10_spill]] }
 0x23f   : > { %p18_p10 = scmp.ge.s32.totalorder %s21_s25, 6   ;;  %s1209_s30 = sld [smem:[#allocation8_spill]] }
 0x240   : > { %s1210_s6 = sld [smem:[#allocation9_spill]]  ;;  %s1211_s15 = smov %s848_s16 }
 0x241   : > { %s1212_s16 = smov %s852_s17  ;;  %s1214_s18 = smov %s860_s19 }
 0x242   : > { %s1215_s19 = smov %s864_s20  ;;  %s1216_s20 = smov %s1010_s13 }
 0x243   : > { %s1217_s21 = smov %s876_s23  ;;  %s1218_s22 = smov %s880_s24 }
 0x244   : > { %s1213_s17 = smov %s1208_s11  ;;  %20 = sbr.rel (!%p18_p10) target bundleno = 9 (0x9), region = 93 }
 0x245   : > { %s1219_s23 = smov %s1209_s30 }
 0x246   : > { %s1220_s24 = smov %s1210_s6 }
 0x24b   :  { %478 = vsyncpa [#allocation3], 1 }
 0x24c   :  { %480 = vsyncpa [#allocation3 + $0x1], 1 }
 0x24d   :  { %481 = vsyncpa [#allocation4], 1 }
 0x24e   :  { %483 = vsyncpa [#allocation4 + $0x1], 1 }

</bundles_post_ra>
